<compile_context>
chip_gen: v7x
topology: tpu7x:2x2x1
jax: 0.10.0
libtpu: 0.0.40
codegen_flags: <defaults>
</compile_context>

<pallas_src>
import math

import jax
import jax.numpy as jnp
from jax.experimental import pallas as pl
from jax.experimental.pallas import tpu as pltpu

HIDDEN = 1024  # fixed by nn.Linear(img_code_len, 1024)


def _round_up(a, m):
    return ((a + m - 1) // m) * m


def _img2txt_kernel(x_ref, w1_ref, b1_ref, w2_ref, b2_ref, alpha_ref,
                    feat_ref, hid_ref, code_ref):
    # x_ref   : (TM, Din)  f32 VMEM
    # w1_ref  : (Din, H)   f32 VMEM   (fc1 weight, pre-transposed, whole)
    # b1_ref  : (1, H)     f32 VMEM
    # w2_ref  : (H, Dp)    f32 VMEM   (fc2 weight, pre-transposed, Dout padded to Dp)
    # b2_ref  : (1, Dp)    f32 VMEM
    # alpha_ref : (1,)     f32 SMEM scalar
    # feat_ref: (TM, H)    feat_dtype VMEM
    # hid_ref : (TM, Dp)   f32 VMEM
    # code_ref: (TM, Dp)   f32 VMEM
    x = x_ref[...]
    h1 = jnp.dot(x, w1_ref[...], preferred_element_type=jnp.float32)   # MXU
    feat = jnp.maximum(h1 + b1_ref[...], 0.0)                          # relu (VPU, f32)
    feat_ref[...] = feat.astype(feat_ref.dtype)

    hid = jnp.dot(feat, w2_ref[...], preferred_element_type=jnp.float32) + b2_ref[...]
    hid_ref[...] = hid.astype(hid_ref.dtype)

    alpha = alpha_ref[0]
    code_ref[...] = jnp.tanh(alpha * hid).astype(code_ref.dtype)       # EUP tanh, f32


def img2txt_forward(x, w1, b1, w2, b2, alpha=1.0, *,
                    block_m=512, feat_dtype=jnp.float32):
    """Fused Img2Txt forward.

    x  : (B, Din) float    — image codes
    w1 : (Din, 1024)       — fc1 weight, pre-transposed (in, out)
    b1 : (1024,)           — fc1 bias
    w2 : (1024, Dout)      — fc2 weight, pre-transposed (in, out)
    b2 : (Dout,)           — fc2 bias
    Returns (feat, hid, code); hid/code are float32, feat is `feat_dtype`.
    """
    B, Din = x.shape
    Din_w, H = w1.shape
    H_w, Dout = w2.shape
    assert Din == Din_w and H == H_w, "weight shapes inconsistent with input"

    f32 = jnp.float32

    # --- lane-dense output padding: Dout -> multiple of 128 -------------------
    Dp = max(128, _round_up(Dout, 128))
    w2_p = w2.astype(f32)
    b2_p = b2.astype(f32)
    if Dp != Dout:
        w2_p = jnp.zeros((H, Dp), f32).at[:, :Dout].set(w2_p)
        b2_p = jnp.zeros((Dp,), f32).at[:Dout].set(b2_p)

    # --- batch tiling ----------------------------------------------------------
    if B <= 8:
        tm = B                      # tiny batch: single full-extent tile
    elif B <= 2 * block_m:
        # >=2 tiles so the "parallel" batch axis can shard across v7x's two TCs.
        tm = min(block_m, _round_up(pl.cdiv(B, 2), 8))
    else:
        tm = block_m
    Bp = _round_up(B, tm)
    grid = (Bp // tm,)

    x_p = x.astype(f32)
    if Bp != B:
        x_p = jnp.zeros((Bp, Din), f32).at[:B].set(x_p)

    w1_p = w1.astype(f32)
    b1_2 = b1.reshape(1, H).astype(f32)
    b2_2 = b2_p.reshape(1, Dp)
    alpha_arr = jnp.full((1,), alpha, dtype=f32)

    # --- honest VMEM budget: double-buffered blocks only -----------------------
    fbytes = jnp.dtype(feat_dtype).itemsize
    vmem_est = 2 * (tm * Din * 4            # x block
                    + Din * H * 4 + H * 4   # w1, b1 (whole)
                    + H * Dp * 4 + Dp * 4   # w2, b2 (whole)
                    + tm * H * fbytes       # feat block
                    + 2 * tm * Dp * 4)      # hid + code blocks
    vmem_limit = int(min(max(vmem_est + (4 << 20), 8 << 20), 32 << 20))

    cost = pl.CostEstimate(
        flops=2 * Bp * Din * H + 2 * Bp * H * Dp,
        transcendentals=Bp * Dp,
        bytes_accessed=(Bp * Din * 4 + Din * H * 4 + H * 4 + H * Dp * 4 + Dp * 4
                        + Bp * H * fbytes + 2 * Bp * Dp * 4),
    )

    out_shapes = (
        jax.ShapeDtypeStruct((Bp, H), feat_dtype),   # feat
        jax.ShapeDtypeStruct((Bp, Dp), f32),         # hid  (Dout padded)
        jax.ShapeDtypeStruct((Bp, Dp), f32),         # code (Dout padded)
    )

    feat, hid, code = pl.pallas_call(
        _img2txt_kernel,
        out_shape=out_shapes,
        grid_spec=pltpu.PrefetchScalarGridSpec(
            num_scalar_prefetch=0,
            grid=grid,
            in_specs=[
                pl.BlockSpec((tm, Din), lambda i: (i, 0)),   # x
                pl.BlockSpec((Din, H), lambda i: (0, 0)),    # w1 (whole, fetched once)
                pl.BlockSpec((1, H), lambda i: (0, 0)),      # b1
                pl.BlockSpec((H, Dp), lambda i: (0, 0)),     # w2 (whole, fetched once)
                pl.BlockSpec((1, Dp), lambda i: (0, 0)),     # b2
                pl.BlockSpec(memory_space=pltpu.MemorySpace.SMEM),  # alpha scalar
            ],
            out_specs=[
                pl.BlockSpec((tm, H), lambda i: (i, 0)),     # feat
                pl.BlockSpec((tm, Dp), lambda i: (i, 0)),    # hid
                pl.BlockSpec((tm, Dp), lambda i: (i, 0)),    # code
            ],
        ),
        compiler_params=pltpu.CompilerParams(
            dimension_semantics=("parallel",),
            vmem_limit_bytes=vmem_limit,
        ),
        cost_estimate=cost,
    )(x_p, w1_p, b1_2, w2_p, b2_2, alpha_arr)

    # Strip batch / lane padding on the host.
    feat = feat[:B]
    hid = hid[:B, :Dout]
    code = code[:B, :Dout]
    return feat, hid, code


if __name__ == "__main__":
    key = jax.random.PRNGKey(0)
    kx, kw1, kb1, kw2, kb2 = jax.random.split(key, 5)

    img_code_len = 32
    txt_code_len = 32
    B = 2
    H = HIDDEN

    x = jax.random.normal(kx, (B, img_code_len), dtype=jnp.float32)

    # Deterministic init matching nn.Linear fan-in bounds; weights pre-transposed.
    bound1 = 1.0 / math.sqrt(img_code_len)
    w1 = jax.random.uniform(kw1, (img_code_len, H), minval=-bound1, maxval=bound1,
                            dtype=jnp.float32)
    b1 = jax.random.uniform(kb1, (H,), minval=-bound1, maxval=bound1,
                            dtype=jnp.float32)
    bound2 = 1.0 / math.sqrt(H)
    w2 = jax.random.uniform(kw2, (H, txt_code_len), minval=-bound2, maxval=bound2,
                            dtype=jnp.float32)
    b2 = jax.random.uniform(kb2, (txt_code_len,), minval=-bound2, maxval=bound2,
                            dtype=jnp.float32)

    # TODO(synk): set_alpha(epoch) is host-side training-schedule state; the
    # resulting scalar is simply passed in at call time.
    alpha = math.pow(1.0 * 3 + 1.0, 0.5)  # epoch = 3 -> alpha = 2.0

    feat, hid, code = img2txt_forward(x, w1, b1, w2, b2, alpha=alpha)
    feat, hid, code = jax.block_until_ready((feat, hid, code))

    assert feat.shape == (B, H)
    assert hid.shape == (B, txt_code_len)
    assert code.shape == (B, txt_code_len)

    # Pure-f32 reference (the kernel keeps everything in f32, so this is tight).
    feat_ref = jnp.maximum(
        jnp.dot(x, w1, precision=jax.lax.Precision.HIGHEST) + b1, 0.0)
    hid_ref = jnp.dot(feat_ref, w2, precision=jax.lax.Precision.HIGHEST) + b2
    code_ref = jnp.tanh(alpha * hid_ref)

    assert jnp.allclose(feat, feat_ref, atol=2e-3, rtol=2e-3)
    assert jnp.allclose(hid, hid_ref, atol=2e-3, rtol=2e-3)
    assert jnp.allclose(code, code_ref, atol=2e-3, rtol=2e-3)

    print("KERNEL_OK")
</pallas_src>

<mosaic_0001>
module attributes {stable_mosaic.version = 11 : i64} {
  func.func @_img2txt_kernel(%arg0: i32, %arg1: memref<2x32xf32, #tpu.memory_space<vmem>>, %arg2: memref<32x1024xf32, #tpu.memory_space<vmem>>, %arg3: memref<1x1024xf32, #tpu.memory_space<vmem>>, %arg4: memref<1024x128xf32, #tpu.memory_space<vmem>>, %arg5: memref<1x128xf32, #tpu.memory_space<vmem>>, %arg6: memref<1xf32, #tpu.memory_space<smem>>, %arg7: memref<2x1024xf32, #tpu.memory_space<vmem>>, %arg8: memref<2x128xf32, #tpu.memory_space<vmem>>, %arg9: memref<2x128xf32, #tpu.memory_space<vmem>>) attributes {dimension_semantics = [#tpu.dimension_semantics<parallel>], iteration_bounds = array<i64: 1>, scalar_prefetch = 0 : i64, scratch_operands = 0 : i64, tpu.core_type = #tpu.core_type<tc>, window_params = [{transform_indices = @transform_0, window_bounds = array<i64: 2, 32>}, {pipeline_mode = #tpu.pipeline_mode<synchronous>, transform_indices = @transform_1, window_bounds = array<i64: 32, 1024>}, {pipeline_mode = #tpu.pipeline_mode<synchronous>, transform_indices = @transform_2, window_bounds = array<i64: 1, 1024>}, {pipeline_mode = #tpu.pipeline_mode<synchronous>, transform_indices = @transform_3, window_bounds = array<i64: 1024, 128>}, {pipeline_mode = #tpu.pipeline_mode<synchronous>, transform_indices = @transform_4, window_bounds = array<i64: 1, 128>}, {transform_indices = @transform_5, window_bounds = array<i64: 1>}, {transform_indices = @transform_6, window_bounds = array<i64: 2, 1024>}, {transform_indices = @transform_7, window_bounds = array<i64: 2, 128>}, {transform_indices = @transform_8, window_bounds = array<i64: 2, 128>}]} {
    %c0 = arith.constant 0 : index
    %c0_0 = arith.constant 0 : index
    %0 = vector.load %arg1[%c0, %c0_0] : memref<2x32xf32, #tpu.memory_space<vmem>>, vector<2x32xf32>
    %c0_1 = arith.constant 0 : index
    %c0_2 = arith.constant 0 : index
    %1 = vector.load %arg2[%c0_1, %c0_2] : memref<32x1024xf32, #tpu.memory_space<vmem>>, vector<32x1024xf32>
    %cst = arith.constant dense<0.000000e+00> : vector<2x1024xf32>
    %2 = tpu.matmul %0, %1, %cst {dimension_numbers = #tpu.dot_dimension_numbers<[1], [0], [0], [1], [0, 0, 1, 1], [], []>} : vector<2x32xf32>, vector<32x1024xf32>, vector<2x1024xf32> -> vector<2x1024xf32>
    %c0_3 = arith.constant 0 : index
    %c0_4 = arith.constant 0 : index
    %3 = vector.load %arg3[%c0_3, %c0_4] : memref<1x1024xf32, #tpu.memory_space<vmem>>, vector<1x1024xf32>
    %4 = vector.broadcast %3 : vector<1x1024xf32> to vector<2x1024xf32>
    %5 = arith.addf %2, %4 : vector<2x1024xf32>
    %cst_5 = arith.constant 0.000000e+00 : f32
    %6 = vector.broadcast %cst_5 : f32 to vector<2x1024xf32>
    %7 = arith.maximumf %5, %6 : vector<2x1024xf32>
    %c0_6 = arith.constant 0 : index
    %c0_7 = arith.constant 0 : index
    %8 = vector.load %arg7[%c0_6, %c0_7] : memref<2x1024xf32, #tpu.memory_space<vmem>>, vector<2x1024xf32>
    tpu.vector_store %arg7[%c0_6, %c0_7], %7 {strides = array<i32>} : memref<2x1024xf32, #tpu.memory_space<vmem>>, vector<2x1024xf32>,
    %c0_8 = arith.constant 0 : index
    %c0_9 = arith.constant 0 : index
    %9 = vector.load %arg4[%c0_8, %c0_9] : memref<1024x128xf32, #tpu.memory_space<vmem>>, vector<1024x128xf32>
    %cst_10 = arith.constant dense<0.000000e+00> : vector<2x128xf32>
    %10 = tpu.matmul %7, %9, %cst_10 {dimension_numbers = #tpu.dot_dimension_numbers<[1], [0], [0], [1], [0, 0, 1, 1], [], []>} : vector<2x1024xf32>, vector<1024x128xf32>, vector<2x128xf32> -> vector<2x128xf32>
    %c0_11 = arith.constant 0 : index
    %c0_12 = arith.constant 0 : index
    %11 = vector.load %arg5[%c0_11, %c0_12] : memref<1x128xf32, #tpu.memory_space<vmem>>, vector<1x128xf32>
    %12 = vector.broadcast %11 : vector<1x128xf32> to vector<2x128xf32>
    %13 = arith.addf %10, %12 : vector<2x128xf32>
    %c0_13 = arith.constant 0 : index
    %c0_14 = arith.constant 0 : index
    %14 = vector.load %arg8[%c0_13, %c0_14] : memref<2x128xf32, #tpu.memory_space<vmem>>, vector<2x128xf32>
    tpu.vector_store %arg8[%c0_13, %c0_14], %13 {strides = array<i32>} : memref<2x128xf32, #tpu.memory_space<vmem>>, vector<2x128xf32>,
    %c0_15 = arith.constant 0 : index
    %15 = memref.load %arg6[%c0_15] : memref<1xf32, #tpu.memory_space<smem>>
    %16 = vector.broadcast %15 : f32 to vector<2x128xf32>
    %17 = arith.mulf %16, %13 : vector<2x128xf32>
    %18 = math.tanh %17 : vector<2x128xf32>
    %c0_16 = arith.constant 0 : index
    %c0_17 = arith.constant 0 : index
    %19 = vector.load %arg9[%c0_16, %c0_17] : memref<2x128xf32, #tpu.memory_space<vmem>>, vector<2x128xf32>
    tpu.vector_store %arg9[%c0_16, %c0_17], %18 {strides = array<i32>} : memref<2x128xf32, #tpu.memory_space<vmem>>, vector<2x128xf32>,
    return
  }
  func.func @transform_0(%arg0: i32) -> (i32, i32) {
    %c0_i32 = arith.constant 0 : i32
    %c0_i32_0 = arith.constant 0 : i32
    return %arg0, %c0_i32 : i32, i32
  }
  func.func @transform_1(%arg0: i32) -> (i32, i32) {
    %c0_i32 = arith.constant 0 : i32
    %c0_i32_0 = arith.constant 0 : i32
    %c0_i32_1 = arith.constant 0 : i32
    return %c0_i32, %c0_i32_0 : i32, i32
  }
  func.func @transform_2(%arg0: i32) -> (i32, i32) {
    %c0_i32 = arith.constant 0 : i32
    %c0_i32_0 = arith.constant 0 : i32
    %c0_i32_1 = arith.constant 0 : i32
    return %c0_i32, %c0_i32_0 : i32, i32
  }
  func.func @transform_3(%arg0: i32) -> (i32, i32) {
    %c0_i32 = arith.constant 0 : i32
    %c0_i32_0 = arith.constant 0 : i32
    %c0_i32_1 = arith.constant 0 : i32
    return %c0_i32, %c0_i32_0 : i32, i32
  }
  func.func @transform_4(%arg0: i32) -> (i32, i32) {
    %c0_i32 = arith.constant 0 : i32
    %c0_i32_0 = arith.constant 0 : i32
    %c0_i32_1 = arith.constant 0 : i32
    return %c0_i32, %c0_i32_0 : i32, i32
  }
  func.func @transform_5(%arg0: i32) -> i32 {
    %c0_i32 = arith.constant 0 : i32
    %c0_i32_0 = arith.constant 0 : i32
    return %c0_i32 : i32
  }
  func.func @transform_6(%arg0: i32) -> (i32, i32) {
    %c0_i32 = arith.constant 0 : i32
    %c0_i32_0 = arith.constant 0 : i32
    return %arg0, %c0_i32 : i32, i32
  }
  func.func @transform_7(%arg0: i32) -> (i32, i32) {
    %c0_i32 = arith.constant 0 : i32
    %c0_i32_0 = arith.constant 0 : i32
    return %arg0, %c0_i32 : i32, i32
  }
  func.func @transform_8(%arg0: i32) -> (i32, i32) {
    %c0_i32 = arith.constant 0 : i32
    %c0_i32_0 = arith.constant 0 : i32
    return %arg0, %c0_i32 : i32, i32
  }
}

</mosaic_0001>

<bundles_post_ra>
// kernel: tpu_custom_call.1
= control target key start
LH: loop header
LB: loop body
LE: loop exit
PB: predicated region body
PF: predicated region fallthrough
CT: control target
= control target key end

     0   :  { %15 = vsyncpa [#allocation4], 0  ;;  %s1536_s0 = inlined_call_operand.vmem [shape: f32[2,32], index: 0, kind: input, shape index: {}]   ;;  %s1537_s1 = inlined_call_operand.hbm [shape: f32[32,1024], index: 1, kind: input, shape index: {}]   ;;  %s1538_s2 = inlined_call_operand.vmem [shape: f32[1,1024], index: 2, kind: input, shape index: {}]   ;;  %s1539_s3 = inlined_call_operand.hbm [shape: f32[1024,128], index: 3, kind: input, shape index: {}]   ;;  %s1540_s4 = inlined_call_operand.vmem [shape: f32[1,128], index: 4, kind: input, shape index: {}]   ;;  %s1541_s5 = inlined_call_operand.<no memory space> [shape: f32[1], index: 5, kind: input, shape index: {}]   ;;  %s1542_s6 = inlined_call_operand.hbm [shape: f32[2,1024], index: 6, kind: output, shape index: {0}]   ;;  %s1543_s7 = inlined_call_operand.hbm [shape: f32[2,128], index: 7, kind: output, shape index: {1}]   ;;  %s1544_s8 = inlined_call_operand.hbm [shape: f32[2,128], index: 8, kind: output, shape index: {2}]  }
   0x1   :  { %16 = vsyncpa [#allocation7], 0 }
   0x2   :  { %17 = vsyncpa [#allocation5], 0 }
   0x3   :  { %18 = vsyncpa [#allocation10], 0  ;;  %s1374_s27 = smov [#allocation3]   ;;  %s1256_s9 = scalar_lea.hbm %s1537_s1, 4096 }
   0x4   :  { %s26_s28 = sshll.u32 %s1374_s27, 4  ;;  %p1257_p0 = scmp.ne.s32.totalorder %s1537_s1, %s1256_s9  ;;  %s27_s28 = int_to_ptr.vmem [resolvable:$true] %s26_s28 }
   0x5   :  { %p1260_p1 = scmp.lt.u32.totalorder %s1256_s9, %s1537_s1 }
   0x7   :  { %p1262_p2 = pnand %p1260_p1, %p1257_p0 }
   0x9   :  { %1265 = shalt.err (!%p1262_p2)
}
   0xa   :  { %s1266_s14 = scalar_lea.vmem %s27_s28, 4096  ;;  %p1271_p4 = scmp.lt.s32.totalorder %s27_s28, %s27_s28 }
   0xb   :  { %p1267_p3 = scmp.ne.s32.totalorder %s27_s28, %s1266_s14  ;;  %p1272_p5 = scmp.lt.s32.totalorder %s1266_s14, %s1266_s14 }
   0xd   :  { %p1273_p6 = por %p1272_p5, %p1271_p4 }
   0xf   :  { %p1274_p7 = pnand %p1273_p6, %p1267_p3 }
  0x11   :  { %1277 = shalt.err (!%p1274_p7)
}
  0x12   :  { %s1375_s15 = smov 1024   ;;  %s1376_s16 = smov 64  }
  0x13   :  { %32 = dma.hbm_to_vmem [thread:$0]  %s1537_s1, 4096, %s27_s28, [#allocation4], %s1375_s15, %s1375_s15, %s1376_s16  }
  0x14   :  { %s1377_s19 = smov [#allocation6]   ;;  %s1278_s23 = scalar_lea.hbm %s1539_s3, 16384 }
  0x15   :  { %s40_s20 = sshll.u32 %s1377_s19, 4  ;;  %p1279_p8 = scmp.ne.s32.totalorder %s1539_s3, %s1278_s23  ;;  %s41_s20 = int_to_ptr.vmem [resolvable:$true] %s40_s20 }
  0x16   :  { %p1282_p9 = scmp.lt.u32.totalorder %s1278_s23, %s1539_s3 }
  0x18   :  { %p1284_p10 = pnand %p1282_p9, %p1279_p8 }
  0x1a   :  { %1287 = shalt.err (!%p1284_p10)
}
  0x1b   :  { %s1288_s29 = scalar_lea.vmem %s41_s20, 16384  ;;  %p1293_p12 = scmp.lt.s32.totalorder %s41_s20, %s41_s20 }
  0x1c   :  { %p1289_p11 = scmp.ne.s32.totalorder %s41_s20, %s1288_s29  ;;  %p1294_p13 = scmp.lt.s32.totalorder %s1288_s29, %s1288_s29 }
  0x1e   :  { %p1295_p0 = por %p1294_p13, %p1293_p12 }
  0x20   :  { %p1296_p1 = pnand %p1295_p0, %p1289_p11 }
  0x22   :  { %1299 = shalt.err (!%p1296_p1)
}
  0x23   :  { %s1378_s1 = smov 128   ;;  %s1379_s28 = smov 8  }
  0x24   :  { %46 = dma.hbm_to_vmem [thread:$0]  %s1539_s3, 16384, %s41_s20, [#allocation7], %s1378_s1, %s1378_s1, %s1379_s28  }
  0x25   :  { %1366 = dma.done.wait [#allocation4], 4096  }
  0x26   :  { %1367 = vsyncadd [#allocation4], 4294963200 }
  0x27   :  { %1368 = dma.done.wait [#allocation7], 16384  }
  0x28   :  { %1369 = vsyncadd [#allocation7], 4294950912  ;;  %v1380_v0 = vmov 0.0   ;;  %v59_v1 = vld [vmem:[#allocation3 + $0x8] sm:$0xff]  ;;  %v61_v3 = vld [vmem:[#allocation3 + $0x18] sm:$0xff]  ;;  %vm132_vm0 = vcmask 261120  }
  0x29   :  { %200 = vmatprep.mubr.f32.mxu0 %v1380_v0  ;;  %271 = vmatprep.mubr.f32.mxu1 %v1380_v0  ;;  %v67_v2 = vld [vmem:[#allocation3 + $0x48] sm:$0xff]  ;;  %v69_v5 = vld [vmem:[#allocation3 + $0x58] sm:$0xff]  ;;  %v58_v6 = vld [vmem:[#allocation3] sm:$0xff] }
  0x2a   :  { %v1083_v4 = vpack.c.bf16 %v67_v2, %v59_v1  ;;  %v66_v7 = vld [vmem:[#allocation3 + $0x40] sm:$0xff]  ;;  %v1091_v8 = vpack.c.bf16 %v69_v5, %v61_v3  ;;  %v60_v10 = vld [vmem:[#allocation3 + $0x10] sm:$0xff]  ;;  %v75_v12 = vld [vmem:[#allocation3 + $0x88] sm:$0xff] }
  0x2b   :  { %v1085_v9 = vpack.c.bf16 %v66_v7, %v58_v6  ;;  %v68_v11 = vld [vmem:[#allocation3 + $0x50] sm:$0xff]  ;;  %v83_v14 = vld [vmem:[#allocation3 + $0xc8] sm:$0xff]  ;;  %v77_v15 = vld [vmem:[#allocation3 + $0x98] sm:$0xff] }
  0x2c   :  { %1084 = vmatprep.subr.bf16.mxu0 %v1083_v4  ;;  %v1093_v13 = vpack.c.bf16 %v68_v11, %v60_v10  ;;  %v85_v16 = vld [vmem:[#allocation3 + $0xd8] sm:$0xff]  ;;  %1092 = vmatprep.subr.bf16.mxu1 %v1091_v8  ;;  %v1087_v17 = vpack.c.bf16 %v83_v14, %v75_v12  ;;  %v74_v19 = vld [vmem:[#allocation3 + $0x80] sm:$0xff]  ;;  %v76_v21 = vld [vmem:[#allocation3 + $0x90] sm:$0xff] }
  0x2d   :  { %1086 = vmatpush1.bf16.msra.mxu0 %v1085_v9  ;;  %v1095_v18 = vpack.c.bf16 %v85_v16, %v77_v15  ;;  %v82_v20 = vld [vmem:[#allocation3 + $0xc0] sm:$0xff]  ;;  %v84_v23 = vld [vmem:[#allocation3 + $0xd0] sm:$0xff]  ;;  %v63_v24 = vld [vmem:[#allocation3 + $0x28] sm:$0xff] }
  0x2e   :  { %1094 = vmatpush1.bf16.msra.mxu1 %v1093_v13  ;;  %v1089_v22 = vpack.c.bf16 %v82_v20, %v74_v19  ;;  %1088 = vmatprep.subr.bf16.mxu0 %v1087_v17  ;;  %v1097_v25 = vpack.c.bf16 %v84_v23, %v76_v21  ;;  %v1459_v26 = vld [vmem:[%s1536_s0] sm:$0x3]  ;;  %v71_v27 = vld [vmem:[#allocation3 + $0x68] sm:$0xff]  ;;  %v65_v28 = vld [vmem:[#allocation3 + $0x38] sm:$0xff] }
  0x2f   :  { %1096 = vmatprep.subr.bf16.mxu1 %v1095_v18  ;;  %v73_v29 = vld [vmem:[#allocation3 + $0x78] sm:$0xff]  ;;  %v1099_v30 = vpack.c.bf16 %v71_v27, %v63_v24  ;;  %v62_v32 = vld [vmem:[#allocation3 + $0x20] sm:$0xff]  ;;  %v64_v34 = vld [vmem:[#allocation3 + $0x30] sm:$0xff] }
  0x30   :  { %v1107_v31 = vpack.c.bf16 %v73_v29, %v65_v28  ;;  %v70_v33 = vld [vmem:[#allocation3 + $0x60] sm:$0xff]  ;;  %v72_v36 = vld [vmem:[#allocation3 + $0x70] sm:$0xff]  ;;  %v79_v37 = vld [vmem:[#allocation3 + $0xa8] sm:$0xff] }
  0x31   :  { %1090 = vmatpush1.bf16.msra.mxu0 %v1089_v22  ;;  %v1101_v35 = vpack.c.bf16 %v70_v33, %v62_v32  ;;  %v87_v38 = vld [vmem:[#allocation3 + $0xe8] sm:$0xff]  ;;  %v1109_v39 = vpack.c.bf16 %v72_v36, %v64_v34  ;;  %v81_v41 = vld [vmem:[#allocation3 + $0xb8] sm:$0xff]  ;;  %v78_v43 = vld [vmem:[#allocation3 + $0xa0] sm:$0xff] }
  0x32   :  { %1098 = vmatpush1.bf16.msra.mxu1 %v1097_v25  ;;  %1100 = vmatprep.subr.bf16.mxu0 %v1099_v30  ;;  %v1103_v40 = vpack.c.bf16 %v87_v38, %v79_v37  ;;  %v89_v42 = vld [vmem:[#allocation3 + $0xf8] sm:$0xff]  ;;  %v86_v45 = vld [vmem:[#allocation3 + $0xe0] sm:$0xff]  ;;  %v80_v46 = vld [vmem:[#allocation3 + $0xb0] sm:$0xff] }
  0x33   :  { %1108 = vmatprep.subr.bf16.mxu1 %v1107_v31  ;;  %v1111_v44 = vpack.c.bf16 %v89_v42, %v81_v41  ;;  %v88_v47 = vld [vmem:[#allocation3 + $0xf0] sm:$0xff]  ;;  %v490_v48 = vld [vmem:[#allocation6 + $0x80] sm:$0xff]  ;;  %v491_v49 = vld [vmem:[#allocation6 + $0x88] sm:$0xff]  ;;  %v1105_v51 = vpack.c.bf16 %v86_v45, %v78_v43 }
  0x34   :  { %938 = vmatmul.mubr.msk.f32.vlgmr.msra.gmra.mrb[0].mxu0 %vm132_vm0, %v1459_v26  ;;  %v522_v50 = vld [vmem:[#allocation6 + $0x180] sm:$0xff]  ;;  %v523_v52 = vld [vmem:[#allocation6 + $0x188] sm:$0xff]  ;;  %v1113_v53 = vpack.c.bf16 %v88_v47, %v80_v46  ;;  %v1115_v54 = vpack.c.bf16 %v491_v49, %v490_v48  ;;  %v492_v60 = vld [vmem:[#allocation6 + $0x90] sm:$0xff] }
  0x35   :  { %939 = vmatmul.mubr.msk.f32.vlgmr.msra.gmra.mrb[0].mxu1 %vm132_vm0, %v1459_v26  ;;  %1102 = vmatpush1.bf16.msra.mxu0 %v1101_v35  ;;  %v474_v55 = vld [vmem:[#allocation6] sm:$0xff]  ;;  %v475_v56 = vld [vmem:[#allocation6 + $0x8] sm:$0xff]  ;;  %v1147_v58 = vpack.c.bf16 %v523_v52, %v522_v50  ;;  %v493_v61 = vld [vmem:[#allocation6 + $0x98] sm:$0xff] }
  0x36   :  { %1110 = vmatpush1.bf16.msra.mxu1 %v1109_v39  ;;  %1104 = vmatprep.subr.bf16.mxu0 %v1103_v40  ;;  %v506_v57 = vld [vmem:[#allocation6 + $0x100] sm:$0xff]  ;;  %v507_v59 = vld [vmem:[#allocation6 + $0x108] sm:$0xff]  ;;  %v524_v62 = vld [vmem:[#allocation6 + $0x190] sm:$0xff]  ;;  %v1117_v1 = vpack.c.bf16 %v475_v56, %v474_v55  ;;  %v1119_v3 = vpack.c.bf16 %v493_v61, %v492_v60 }
  0x37   :  { %1112 = vmatprep.subr.bf16.mxu1 %v1111_v44  ;;  %342 = vmatprep.mubr.f32.mxu0 %v1380_v0  ;;  %v525_v63 = vld [vmem:[#allocation6 + $0x198] sm:$0xff]  ;;  %v1149_v2 = vpack.c.bf16 %v507_v59, %v506_v57  ;;  %v476_v4 = vld [vmem:[#allocation6 + $0x10] sm:$0xff]  ;;  %v494_v9 = vld [vmem:[#allocation6 + $0xa0] sm:$0xff] }
  0x38   :  { %413 = vmatprep.mubr.f32.mxu1 %v1380_v0  ;;  %v477_v5 = vld [vmem:[#allocation6 + $0x18] sm:$0xff]  ;;  %v508_v6 = vld [vmem:[#allocation6 + $0x110] sm:$0xff]  ;;  %v1151_v7 = vpack.c.bf16 %v525_v63, %v524_v62  ;;  %v495_v10 = vld [vmem:[#allocation6 + $0xa8] sm:$0xff] }
  0x39   :  { %1106 = vmatpush1.bf16.msra.mxu0 %v1105_v51  ;;  %v509_v8 = vld [vmem:[#allocation6 + $0x118] sm:$0xff]  ;;  %v526_v0 = vld [vmem:[#allocation6 + $0x1a0] sm:$0xff]  ;;  %v527_v11 = vld [vmem:[#allocation6 + $0x1a8] sm:$0xff]  ;;  %v1121_v12 = vpack.c.bf16 %v477_v5, %v476_v4  ;;  %v1123_v14 = vpack.c.bf16 %v495_v10, %v494_v9 }
  0x3a   :  { %1114 = vmatpush1.bf16.msra.mxu1 %v1113_v53  ;;  %1116 = vmatprep.subr.bf16.mxu0 %v1115_v54  ;;  %v1153_v13 = vpack.c.bf16 %v509_v8, %v508_v6  ;;  %v478_v15 = vld [vmem:[#allocation6 + $0x20] sm:$0xff]  ;;  %v479_v16 = vld [vmem:[#allocation6 + $0x28] sm:$0xff]  ;;  %v1155_v18 = vpack.c.bf16 %v527_v11, %v526_v0  ;;  %v496_v20 = vld [vmem:[#allocation6 + $0xb0] sm:$0xff] }
  0x3b   :  { %1148 = vmatprep.subr.bf16.mxu1 %v1147_v58  ;;  %v510_v17 = vld [vmem:[#allocation6 + $0x120] sm:$0xff]  ;;  %v511_v19 = vld [vmem:[#allocation6 + $0x128] sm:$0xff]  ;;  %v497_v21 = vld [vmem:[#allocation6 + $0xb8] sm:$0xff]  ;;  %v1125_v24 = vpack.c.bf16 %v479_v16, %v478_v15 }
  0x3c   :  { %940 = vmatmul.mubr.msk.f32.vlgmr.msra.gmra.mrb[2].mxu0 %vm132_vm0, %v1459_v26  ;;  %v528_v22 = vld [vmem:[#allocation6 + $0x1b0] sm:$0xff]  ;;  %v529_v23 = vld [vmem:[#allocation6 + $0x1b8] sm:$0xff]  ;;  %v1157_v25 = vpack.c.bf16 %v511_v19, %v510_v17  ;;  %v498_v32 = vld [vmem:[#allocation6 + $0xc0] sm:$0xff] }
  0x3d   :  { %941 = vmatmul.mubr.msk.f32.vlgmr.msra.gmra.mrb[2].mxu1 %vm132_vm0, %v1459_v26  ;;  %1118 = vmatpush3.bf16.msra.mxu0 %v1117_v1  ;;  %v1127_v26 = vpack.c.bf16 %v497_v21, %v496_v20  ;;  %v480_v27 = vld [vmem:[#allocation6 + $0x30] sm:$0xff]  ;;  %v481_v28 = vld [vmem:[#allocation6 + $0x38] sm:$0xff]  ;;  %v1159_v30 = vpack.c.bf16 %v529_v23, %v528_v22  ;;  %v499_v33 = vld [vmem:[#allocation6 + $0xc8] sm:$0xff] }
  0x3e   :  { %1150 = vmatpush3.bf16.msra.mxu1 %v1149_v2  ;;  %1120 = vmatprep.subr.bf16.mxu0 %v1119_v3  ;;  %v512_v29 = vld [vmem:[#allocation6 + $0x130] sm:$0xff]  ;;  %v513_v31 = vld [vmem:[#allocation6 + $0x138] sm:$0xff]  ;;  %v530_v34 = vld [vmem:[#allocation6 + $0x1c0] sm:$0xff]  ;;  %v1129_v36 = vpack.c.bf16 %v481_v28, %v480_v27  ;;  %v1131_v38 = vpack.c.bf16 %v499_v33, %v498_v32 }
  0x3f   :  { %1152 = vmatprep.subr.bf16.mxu1 %v1151_v7  ;;  %v531_v35 = vld [vmem:[#allocation6 + $0x1c8] sm:$0xff]  ;;  %v1161_v37 = vpack.c.bf16 %v513_v31, %v512_v29  ;;  %v482_v39 = vld [vmem:[#allocation6 + $0x40] sm:$0xff]  ;;  %v500_v44 = vld [vmem:[#allocation6 + $0xd0] sm:$0xff]  ;;  %v1381_v31 = vmov 1983009808  }
  0x40   :  { %v483_v40 = vld [vmem:[#allocation6 + $0x48] sm:$0xff]  ;;  %v514_v41 = vld [vmem:[#allocation6 + $0x140] sm:$0xff]  ;;  %v1163_v42 = vpack.c.bf16 %v531_v35, %v530_v34  ;;  %v501_v45 = vld [vmem:[#allocation6 + $0xd8] sm:$0xff]  ;;  %v439_v32 = vunpack.c.l.s4 %v1381_v31 }
  0x41   :  { %1122 = vmatpush3.bf16.msra.mxu0 %v1121_v12  ;;  %v515_v43 = vld [vmem:[#allocation6 + $0x148] sm:$0xff]  ;;  %v532_v46 = vld [vmem:[#allocation6 + $0x1d0] sm:$0xff]  ;;  %v533_v47 = vld [vmem:[#allocation6 + $0x1d8] sm:$0xff]  ;;  %v1133_v48 = vpack.c.bf16 %v483_v40, %v482_v39  ;;  %v1135_v50 = vpack.c.bf16 %v501_v45, %v500_v44 }
  0x42   :  { %1154 = vmatpush3.bf16.msra.mxu1 %v1153_v13  ;;  %1124 = vmatprep.subr.bf16.mxu0 %v1123_v14  ;;  %v1165_v49 = vpack.c.bf16 %v515_v43, %v514_v41  ;;  %v484_v51 = vld [vmem:[#allocation6 + $0x50] sm:$0xff]  ;;  %v485_v52 = vld [vmem:[#allocation6 + $0x58] sm:$0xff]  ;;  %v1167_v54 = vpack.c.bf16 %v533_v47, %v532_v46  ;;  %v502_v56 = vld [vmem:[#allocation6 + $0xe0] sm:$0xff] }
  0x43   :  { %1156 = vmatprep.subr.bf16.mxu1 %v1155_v18  ;;  %v516_v53 = vld [vmem:[#allocation6 + $0x150] sm:$0xff]  ;;  %v517_v55 = vld [vmem:[#allocation6 + $0x158] sm:$0xff]  ;;  %v503_v57 = vld [vmem:[#allocation6 + $0xe8] sm:$0xff]  ;;  %v1137_v60 = vpack.c.bf16 %v485_v52, %v484_v51 }
  0x44   :  { %v534_v58 = vld [vmem:[#allocation6 + $0x1e0] sm:$0xff]  ;;  %v535_v59 = vld [vmem:[#allocation6 + $0x1e8] sm:$0xff]  ;;  %v1169_v61 = vpack.c.bf16 %v517_v55, %v516_v53  ;;  %v1139_v62 = vpack.c.bf16 %v503_v57, %v502_v56  ;;  %v504_v7 = vld [vmem:[#allocation6 + $0xf0] sm:$0xff] }
  0x45   :  { %1126 = vmatpush3.bf16.msra.mxu0 %v1125_v24  ;;  %v486_v63 = vld [vmem:[#allocation6 + $0x60] sm:$0xff]  ;;  %v487_v1 = vld [vmem:[#allocation6 + $0x68] sm:$0xff]  ;;  %v1171_v2 = vpack.c.bf16 %v535_v59, %v534_v58  ;;  %v505_v8 = vld [vmem:[#allocation6 + $0xf8] sm:$0xff]  ;;  %v92_v24 = vlaneseq }
  0x46   :  { %1158 = vmatpush3.bf16.msra.mxu1 %v1157_v25  ;;  %1128 = vmatprep.subr.bf16.mxu0 %v1127_v26  ;;  %v518_v3 = vld [vmem:[#allocation6 + $0x160] sm:$0xff]  ;;  %v519_v4 = vld [vmem:[#allocation6 + $0x168] sm:$0xff]  ;;  %v1141_v5 = vpack.c.bf16 %v487_v1, %v486_v63  ;;  %v536_v9 = vld [vmem:[#allocation6 + $0x1f0] sm:$0xff]  ;;  %v1143_v10 = vpack.c.bf16 %v505_v8, %v504_v7 }
  0x47   :  { %1160 = vmatprep.subr.bf16.mxu1 %v1159_v30  ;;  %v1173_v6 = vpack.c.bf16 %v519_v4, %v518_v3  ;;  %v537_v0 = vld [vmem:[#allocation6 + $0x1f8] sm:$0xff]  ;;  %v488_v11 = vld [vmem:[#allocation6 + $0x70] sm:$0xff]  ;;  %v554_v18 = vld [vmem:[#allocation6 + $0x280] sm:$0xff]  ;;  %v93_v25 = vshrl.u32 %v92_v24, 7 }
  0x48   :  { %v489_v12 = vld [vmem:[#allocation6 + $0x78] sm:$0xff]  ;;  %v1175_v13 = vpack.c.bf16 %v537_v0, %v536_v9  ;;  %v520_v15 = vld [vmem:[#allocation6 + $0x170] sm:$0xff]  ;;  %v555_v19 = vld [vmem:[#allocation6 + $0x288] sm:$0xff] }
  0x49   :  { %1130 = vmatpush3.bf16.msra.mxu0 %v1129_v36  ;;  %v1145_v14 = vpack.c.bf16 %v489_v12, %v488_v11  ;;  %v521_v16 = vld [vmem:[#allocation6 + $0x178] sm:$0xff]  ;;  %v586_v20 = vld [vmem:[#allocation6 + $0x380] sm:$0xff]  ;;  %v1179_v21 = vpack.c.bf16 %v555_v19, %v554_v18  ;;  %v587_v22 = vld [vmem:[#allocation6 + $0x388] sm:$0xff]  ;;  %v94_v26 = vsub.s32 0, %v93_v25  ;;  %v102_v28 = vsub.s32 2, %v93_v25 }
  0x4a   :  { %1162 = vmatpush3.bf16.msra.mxu1 %v1161_v37  ;;  %1132 = vmatprep.subr.bf16.mxu0 %v1131_v38  ;;  %v1177_v17 = vpack.c.bf16 %v521_v16, %v520_v15  ;;  %v1211_v23 = vpack.c.bf16 %v587_v22, %v586_v20  ;;  %v90_v27 = vld [vmem:[%s1538_s2] sm:$0xff]  ;;  %v98_v29 = vsub.s32 1, %v93_v25  ;;  %v106_v30 = vsub.s32 3, %v93_v25  ;;  %v539_v43 = vld [vmem:[#allocation6 + $0x208] sm:$0xff]  ;;  %v557_v51 = vld [vmem:[#allocation6 + $0x298] sm:$0xff]  ;;  %s1382_s2 = smov [#allocation8]  }
  0x4b   :  { %1164 = vmatprep.subr.bf16.mxu1 %v1163_v42  ;;  %v95_v33 = vrot.slane %v90_v27, %v94_v26  ;;  %v103_v34 = vrot.slane %v90_v27, %v102_v28  ;;  %v440_v38 = vunpack.c.0.s8 %v439_v32  ;;  %v538_v42 = vld [vmem:[#allocation6 + $0x200] sm:$0xff]  ;;  %v110_v45 = vsub.s32 4, %v93_v25  ;;  %v588_v56 = vld [vmem:[#allocation6 + $0x390] sm:$0xff]  ;;  %v589_v57 = vld [vmem:[#allocation6 + $0x398] sm:$0xff]  ;;  %s901_s12 = sshll.u32 %s1382_s2, 4  ;;  %s902_s12 = int_to_ptr.vmem [resolvable:$true] %s901_s12 }
  0x4c   :  { %v99_v35 = vrot.slane %v90_v27, %v98_v29  ;;  %v107_v36 = vrot.slane %v90_v27, %v106_v30  ;;  %v570_v44 = vld [vmem:[#allocation6 + $0x300] sm:$0xff]  ;;  %v118_v52 = vsub.s32 6, %v93_v25  ;;  %v114_v53 = vsub.s32 5, %v93_v25  ;;  %v540_v63 = vld [vmem:[#allocation6 + $0x210] sm:$0xff]  ;;  %v541_v4 = vld [vmem:[#allocation6 + $0x218] sm:$0xff]  ;;  %s1300_s13 = scalar_lea.vmem %s902_s12, 256  ;;  %p1305_p3 = scmp.lt.s32.totalorder %s902_s12, %s902_s12 }
  0x4d   :  { %1134 = vmatpush3.bf16.msra.mxu0 %v1133_v48  ;;  %v122_v58 = vsub.s32 7, %v93_v25  ;;  %v111_v7 = vrot.slane %v90_v27, %v110_v45  ;;  %v1215_v9 = vpack.c.bf16 %v589_v57, %v588_v56  ;;  %v559_v0 = vld [vmem:[#allocation6 + $0x2a8] sm:$0xff]  ;;  %v1185_v18 = vpack.c.bf16 %v541_v4, %v540_v63  ;;  %v560_v31 = vld [vmem:[#allocation6 + $0x2b0] sm:$0xff]  ;;  %v561_v32 = vld [vmem:[#allocation6 + $0x2b8] sm:$0xff]  ;;  %p1301_p2 = scmp.ne.s32.totalorder %s902_s12, %s1300_s13  ;;  %p1306_p4 = scmp.lt.s32.totalorder %s1300_s13, %s1300_s13 }
  0x4e   :  { %1166 = vmatpush3.bf16.msra.mxu1 %v1165_v49  ;;  %1136 = vmatprep.subr.bf16.mxu0 %v1135_v50  ;;  %v571_v49 = vld [vmem:[#allocation6 + $0x308] sm:$0xff]  ;;  %v556_v50 = vld [vmem:[#allocation6 + $0x290] sm:$0xff]  ;;  %v119_v11 = vrot.slane %v90_v27, %v118_v52  ;;  %v115_v12 = vrot.slane %v90_v27, %v114_v53  ;;  %v1191_v45 = vpack.c.bf16 %v561_v32, %v560_v31  ;;  %v562_v52 = vld [vmem:[#allocation6 + $0x2c0] sm:$0xff] }
  0x4f   :  { %1168 = vmatprep.subr.bf16.mxu1 %v1167_v54  ;;  %v1183_v3 = vpack.c.bf16 %v557_v51, %v556_v50  ;;  %v591_v15 = vld [vmem:[#allocation6 + $0x3a8] sm:$0xff]  ;;  %v123_v16 = vrot.slane %v90_v27, %v122_v58  ;;  %v577_v51 = vld [vmem:[#allocation6 + $0x338] sm:$0xff]  ;;  %v546_v63 = vld [vmem:[#allocation6 + $0x240] sm:$0xff]  ;;  %p1307_p5 = por %p1306_p4, %p1305_p3 }
  0x50   :  { %v543_v24 = vld [vmem:[#allocation6 + $0x228] sm:$0xff]  ;;  %v569_v31 = vld [vmem:[#allocation6 + $0x2f8] sm:$0xff]  ;;  %v600_v32 = vld [vmem:[#allocation6 + $0x3f0] sm:$0xff] }
  0x51   :  { %1138 = vmatpush3.bf16.msra.mxu0 %v1137_v60  ;;  %v575_v30 = vld [vmem:[#allocation6 + $0x328] sm:$0xff]  ;;  %p1308_p6 = pnand %p1307_p5, %p1301_p2 }
  0x52   :  { %1170 = vmatpush3.bf16.msra.mxu1 %v1169_v61  ;;  %1140 = vmatprep.subr.bf16.mxu0 %v1139_v62  ;;  %v1474_v61 = vsub.s32 %v440_v38, %v93_v25  ;;  %v1181_v62 = vpack.c.bf16 %v539_v43, %v538_v42  ;;  %v574_v25 = vld [vmem:[#allocation6 + $0x320] sm:$0xff]  ;;  %v563_v53 = vld [vmem:[#allocation6 + $0x2c8] sm:$0xff] }
  0x53   :  { %1172 = vmatprep.subr.bf16.mxu1 %v1171_v2  ;;  %v1213_v2 = vpack.c.bf16 %v571_v49, %v570_v44  ;;  %v1221_v44 = vpack.c.bf16 %v575_v30, %v574_v25  ;;  %v595_v56 = vld [vmem:[#allocation6 + $0x3c8] sm:$0xff]  ;;  %v568_v30 = vld [vmem:[#allocation6 + $0x2f0] sm:$0xff] }
  0x54   :  { %v551_v25 = vld [vmem:[#allocation6 + $0x268] sm:$0xff] }
  0x55   :  { %1142 = vmatpush3.bf16.msra.mxu0 %v1141_v5  ;;  %v572_v5 = vld [vmem:[#allocation6 + $0x310] sm:$0xff] }
  0x56   :  { %1174 = vmatpush3.bf16.msra.mxu1 %v1173_v6  ;;  %1144 = vmatprep.subr.bf16.mxu0 %v1143_v10  ;;  %v573_v6 = vld [vmem:[#allocation6 + $0x318] sm:$0xff]  ;;  %v558_v10 = vld [vmem:[#allocation6 + $0x2a0] sm:$0xff] }
  0x57   :  { %1176 = vmatprep.subr.bf16.mxu1 %v1175_v13  ;;  %v1217_v19 = vpack.c.bf16 %v573_v6, %v572_v5  ;;  %v1187_v22 = vpack.c.bf16 %v559_v0, %v558_v10  ;;  %v579_v5 = vld [vmem:[#allocation6 + $0x348] sm:$0xff]  ;;  %v564_v6 = vld [vmem:[#allocation6 + $0x2d0] sm:$0xff] }
  0x59   :  { %1146 = vmatpush3.bf16.msra.mxu0 %v1145_v14  ;;  %v590_v14 = vld [vmem:[#allocation6 + $0x3a0] sm:$0xff] }
  0x5a   :  { %1178 = vmatpush3.bf16.msra.mxu1 %v1177_v17  ;;  %1180 = vmatprep.subr.bf16.mxu0 %v1179_v21  ;;  %v1219_v27 = vpack.c.bf16 %v591_v15, %v590_v14  ;;  %v549_v14 = vld [vmem:[#allocation6 + $0x258] sm:$0xff]  ;;  %v580_v15 = vld [vmem:[#allocation6 + $0x350] sm:$0xff] }
  0x5b   :  { %1212 = vmatprep.subr.bf16.mxu1 %v1211_v23  ;;  %v542_v23 = vld [vmem:[#allocation6 + $0x220] sm:$0xff] }
 0x107   :  { %v202_v37 = vpop.f32.mrb[0].mxu0 }
 0x108   :  { %v203_v39 = vadd.f32 %v202_v37, %v95_v33  ;;  %v273_v40 = vpop.f32.mrb[0].mxu1  ;;  %v204_v41 = vpop.f32.mrb[1].mxu0  ;;  %v593_v37 = vld [vmem:[#allocation6 + $0x3b8] sm:$0xff] }
 0x109   :  { %v274_v46 = vadd.f32 %v273_v40, %v103_v34  ;;  %v205_v47 = vadd.f32 %v204_v41, %v99_v35  ;;  %v275_v48 = vpop.f32.mrb[1].mxu1  ;;  %v1189_v41 = vpack.c.bf16 %v543_v24, %v542_v23  ;;  %v550_v24 = vld [vmem:[#allocation6 + $0x260] sm:$0xff] }
 0x10a   :  { %v420_v54 = vmax.f32 %v203_v39, 0.0  ;;  %v276_v55 = vadd.f32 %v275_v48, %v107_v36  ;;  %v592_v36 = vld [vmem:[#allocation6 + $0x3b0] sm:$0xff] }
 0x10b   :  { %v422_v59 = vmax.f32 %v274_v46, 0.0  ;;  %v421_v60 = vmax.f32 %v205_v47, 0.0  ;;  %v544_v46 = vld [vmem:[#allocation6 + $0x230] sm:$0xff]  ;;  %v545_v47 = vld [vmem:[#allocation6 + $0x238] sm:$0xff]  ;;  %v1223_v50 = vpack.c.bf16 %v593_v37, %v592_v36  ;;  %v1207_v37 = vpack.c.bf16 %v569_v31, %v568_v30 }
 0x10c   :  { %v423_v1 = vmax.f32 %v276_v55, 0.0  ;;  %v576_v48 = vld [vmem:[#allocation6 + $0x330] sm:$0xff]  ;;  %v594_v55 = vld [vmem:[#allocation6 + $0x3c0] sm:$0xff]  ;;  %v1193_v58 = vpack.c.bf16 %v545_v47, %v544_v46 }
 0x10d   :  { %v436_v8 = vcombine.low %v420_v54, %v421_v60  ;;  %673 = vmatprep.mubr.f32.mxu0 %v421_v60  ;;  %v1225_v60 = vpack.c.bf16 %v577_v51, %v576_v48  ;;  %v1227_v4 = vpack.c.bf16 %v595_v56, %v594_v55 }
 0x10e   :  { %v437_v13 = vcombine.low %v422_v59, %v423_v1  ;;  %743 = vmatprep.mubr.f32.mxu1 %v423_v1  ;;  %674 = vmatmul.mubr.f32.vlgmr.msra.gmra.mrb[4].mxu0 %v420_v54  ;;  %v547_v1 = vld [vmem:[#allocation6 + $0x248] sm:$0xff] }
 0x10f   :  { %v444_v17 = vrot.slane %v436_v8, %v1474_v61  ;;  %744 = vmatmul.mubr.f32.vlgmr.msra.gmra.mrb[4].mxu1 %v422_v59  ;;  %1182 = vmatpush3.bf16.msra.mxu0 %v1181_v62  ;;  %v344_v20 = vpop.f32.mrb[2].mxu0  ;;  %v1195_v62 = vpack.c.bf16 %v563_v53, %v562_v52  ;;  %v596_v8 = vld [vmem:[#allocation6 + $0x3d0] sm:$0xff]  ;;  %v1197_v0 = vpack.c.bf16 %v547_v1, %v546_v63 }
 0x110   :  { %v451_v21 = vrot.slane %v437_v13, %v1474_v61  ;;  %1214 = vmatpush3.bf16.msra.mxu1 %v1213_v2  ;;  %1184 = vmatprep.subr.bf16.mxu0 %v1183_v3  ;;  %v1478_v26 = vadd.f32 %v344_v20, %v111_v7  ;;  %v415_v28 = vpop.f32.mrb[2].mxu1  ;;  %v346_v29 = vpop.f32.mrb[3].mxu0  ;;  %v578_v2 = vld [vmem:[#allocation6 + $0x340] sm:$0xff]  ;;  %v565_v7 = vld [vmem:[#allocation6 + $0x2d8] sm:$0xff]  ;;  %v548_v13 = vld [vmem:[#allocation6 + $0x250] sm:$0xff] }
 0x111   :  { %1216 = vmatprep.subr.bf16.mxu1 %v1215_v9  ;;  %v1480_v33 = vadd.f32 %v415_v28, %v119_v11  ;;  %v347_v34 = vadd.f32 %v346_v29, %v115_v12  ;;  %v417_v35 = vpop.f32.mrb[3].mxu1  ;;  %v597_v9 = vld [vmem:[#allocation6 + $0x3d8] sm:$0xff]  ;;  %v1229_v11 = vpack.c.bf16 %v579_v5, %v578_v2  ;;  %v1199_v12 = vpack.c.bf16 %v565_v7, %v564_v6  ;;  %v599_v20 = vld [vmem:[#allocation6 + $0x3e8] sm:$0xff]  ;;  %v582_v28 = vld [vmem:[#allocation6 + $0x360] sm:$0xff] }
 0x112   :  { %v424_v38 = vmax.f32 %v1478_v26, 0.0  ;;  %v418_v39 = vadd.f32 %v417_v35, %v123_v16  ;;  %v452_v40 = vcombine.low %v444_v17, %v451_v21  ;;  %v581_v16 = vld [vmem:[#allocation6 + $0x358] sm:$0xff]  ;;  %v566_v17 = vld [vmem:[#allocation6 + $0x2e0] sm:$0xff]  ;;  %v1201_v21 = vpack.c.bf16 %v549_v14, %v548_v13 }
 0x113   :  { %1186 = vmatpush3.bf16.msra.mxu0 %v1185_v18  ;;  %v426_v42 = vmax.f32 %v1480_v33, 0.0  ;;  %v425_v43 = vmax.f32 %v347_v34, 0.0  ;;  %v567_v18 = vld [vmem:[#allocation6 + $0x2e8] sm:$0xff]  ;;  %v601_v34 = vld [vmem:[#allocation6 + $0x3f8] sm:$0xff]  ;;  %v1205_v35 = vpack.c.bf16 %v551_v25, %v550_v24 }
 0x114   :  { %1218 = vmatpush3.bf16.msra.mxu1 %v1217_v19  ;;  %1188 = vmatprep.subr.bf16.mxu0 %v1187_v22  ;;  %v427_v49 = vmax.f32 %v418_v39, 0.0  ;;  %472 = vst [vmem:[#allocation8] sm:$0xff] %v452_v40  ;;  %v598_v19 = vld [vmem:[#allocation6 + $0x3e0] sm:$0xff]  ;;  %v1233_v22 = vpack.c.bf16 %v581_v16, %v580_v15  ;;  %v1203_v23 = vpack.c.bf16 %v567_v18, %v566_v17  ;;  %v552_v39 = vld [vmem:[#allocation6 + $0x270] sm:$0xff]  ;;  %v553_v40 = vld [vmem:[#allocation6 + $0x278] sm:$0xff] }
 0x115   :  { %1220 = vmatprep.subr.bf16.mxu1 %v1219_v27  ;;  %v453_v54 = vcombine.low %v424_v38, %v425_v43  ;;  %813 = vmatprep.mubr.f32.mxu0 %v425_v43  ;;  %v1235_v29 = vpack.c.bf16 %v599_v20, %v598_v19  ;;  %v583_v27 = vld [vmem:[#allocation6 + $0x368] sm:$0xff]  ;;  %v584_v43 = vld [vmem:[#allocation6 + $0x370] sm:$0xff] }
 0x116   :  { %v454_v57 = vcombine.low %v426_v42, %v427_v49  ;;  %883 = vmatprep.mubr.f32.mxu1 %v427_v49  ;;  %v1237_v36 = vpack.c.bf16 %v583_v27, %v582_v28 }
 0x117   :  { %1190 = vmatpush3.bf16.msra.mxu0 %v1189_v41  ;;  %v461_v59 = vrot.slane %v453_v54, %v1474_v61  ;;  %v1239_v41 = vpack.c.bf16 %v601_v34, %v600_v32 }
 0x118   :  { %1222 = vmatpush3.bf16.msra.mxu1 %v1221_v44  ;;  %1192 = vmatprep.subr.bf16.mxu0 %v1191_v45  ;;  %v468_v3 = vrot.slane %v454_v57, %v1474_v61  ;;  %v1231_v61 = vpack.c.bf16 %v597_v9, %v596_v8  ;;  %v585_v44 = vld [vmem:[#allocation6 + $0x378] sm:$0xff]  ;;  %v1209_v45 = vpack.c.bf16 %v553_v40, %v552_v39 }
 0x119   :  { %1224 = vmatprep.subr.bf16.mxu1 %v1223_v50  ;;  %v1241_v46 = vpack.c.bf16 %v585_v44, %v584_v43 }
 0x11a   :  { %v469_v10 = vcombine.low %v461_v59, %v468_v3 }
 0x11b   :  { %1194 = vmatpush3.bf16.msra.mxu0 %v1193_v58 }
 0x11c   :  { %1226 = vmatpush3.bf16.msra.mxu1 %v1225_v60  ;;  %1196 = vmatprep.subr.bf16.mxu0 %v1195_v62  ;;  %473 = vst [vmem:[#allocation8 + $0x8] sm:$0xff] %v469_v10 }
 0x11d   :  { %1228 = vmatprep.subr.bf16.mxu1 %v1227_v4 }
 0x11f   :  { %1198 = vmatpush3.bf16.msra.mxu0 %v1197_v0 }
 0x120   :  { %1230 = vmatpush3.bf16.msra.mxu1 %v1229_v11  ;;  %1200 = vmatprep.subr.bf16.mxu0 %v1199_v12 }
 0x121   :  { %1232 = vmatprep.subr.bf16.mxu1 %v1231_v61 }
 0x123   :  { %1202 = vmatpush3.bf16.msra.mxu0 %v1201_v21 }
 0x124   :  { %1234 = vmatpush3.bf16.msra.mxu1 %v1233_v22  ;;  %1204 = vmatprep.subr.bf16.mxu0 %v1203_v23 }
 0x125   :  { %1236 = vmatprep.subr.bf16.mxu1 %v1235_v29 }
 0x127   :  { %1206 = vmatpush3.bf16.msra.mxu0 %v1205_v35 }
 0x128   :  { %1238 = vmatpush3.bf16.msra.mxu1 %v1237_v36  ;;  %1208 = vmatprep.subr.bf16.mxu0 %v1207_v37 }
 0x129   :  { %1240 = vmatprep.subr.bf16.mxu1 %v1239_v41 }
 0x12b   :  { %1210 = vmatpush3.bf16.msra.mxu0 %v1209_v45 }
 0x12c   :  { %1242 = vmatpush3.bf16.msra.mxu1 %v1241_v46 }
 0x12e   :  { %814 = vmatmul.mubr.f32.vlgmr.msra.gmra.mrb[6].mxu0 %v424_v38 }
 0x12f   :  { %884 = vmatmul.mubr.f32.vlgmr.msra.gmra.mrb[6].mxu1 %v426_v42 }
 0x130   :  { %1311 = shalt.err (!%p1308_p6)
}
 0x131   :  { %s1312_s16 = scalar_lea.hbm %s1542_s6, 256 }
 0x132   :  { %p1313_p7 = scmp.ne.s32.totalorder %s1542_s6, %s1312_s16  ;;  %p1316_p8 = scmp.lt.u32.totalorder %s1312_s16, %s1542_s6 }
 0x134   :  { %p1318_p9 = pnand %p1316_p8, %p1313_p7 }
 0x136   :  { %1321 = shalt.err (!%p1318_p9)
}
 0x137   :  { %904 = dma.vmem_to_hbm [thread:$0]  %s902_s12, 256, %s1542_s6, [#allocation5]   ;;  %v942_v38 = vld [vmem:[%s1540_s4] ss:$0 sm:$0xff]  ;;  %v891_v59 = vstv %s1541_s5 }
 0x138   :  { %s1383_s25 = smov [#allocation9]  }
 0x139   :  { %s911_s6 = sshll.u32 %s1383_s25, 4  ;;  %s912_s6 = int_to_ptr.vmem [resolvable:$true] %s911_s6 }
 0x13a   :  { %s1322_s4 = scalar_lea.vmem %s912_s6, 32  ;;  %p1327_p11 = scmp.lt.s32.totalorder %s912_s6, %s912_s6 }
 0x13b   :  { %p1323_p10 = scmp.ne.s32.totalorder %s912_s6, %s1322_s4  ;;  %p1328_p12 = scmp.lt.s32.totalorder %s1322_s4, %s1322_s4 }
 0x13d   :  { %p1329_p13 = por %p1328_p12, %p1327_p11 }
 0x13f   :  { %p1330_p0 = pnand %p1329_p13, %p1323_p10 }
 0x1e1   :  { %v975_v26 = vpop.f32.mrb[4].mxu0 }
 0x1e2   :  { %v1010_v33 = vpop.f32.mrb[4].mxu1  ;;  %v976_v42 = vpop.f32.mrb[5].mxu0 }
 0x1e3   :  { %v977_v47 = vadd.f32 %v976_v42, %v975_v26  ;;  %v1011_v48 = vpop.f32.mrb[5].mxu1 }
 0x1e4   :  { %v1012_v49 = vadd.f32 %v1011_v48, %v1010_v33 }
 0x1e5   :  { %v676_v50 = vadd.f32 %v977_v47, %v942_v38 }
 0x1e7   :  { %v746_v51 = vadd.f32 %v1012_v49, %v676_v50 }
 0x201   :  { %v1045_v52 = vpop.f32.mrb[6].mxu0 }
 0x202   :  { %v1080_v53 = vpop.f32.mrb[6].mxu1  ;;  %v1046_v54 = vpop.f32.mrb[7].mxu0 }
 0x203   :  { %v1047_v55 = vadd.f32 %v1046_v54, %v1045_v52  ;;  %v1081_v56 = vpop.f32.mrb[7].mxu1 }
 0x204   :  { %v1082_v57 = vadd.f32 %v1081_v56, %v1080_v53 }
 0x205   :  { %v816_v58 = vadd.f32 %v1047_v55, %v746_v51 }
 0x207   :  { %v886_v60 = vadd.f32 %v1082_v57, %v816_v58 }
 0x209   :  { %v892_v62 = vmul.f32 %v891_v59, %v886_v60  ;;  %889 = vst [vmem:[#allocation9] sm:$0x3] %v886_v60 }
 0x20a   :  { %1333 = shalt.err (!%p1330_p0)
}
 0x20b   :  { %s1334_s28 = scalar_lea.hbm %s1543_s7, 32 }
 0x20c   :  { %p1335_p1 = scmp.ne.s32.totalorder %s1543_s7, %s1334_s28  ;;  %p1338_p2 = scmp.lt.u32.totalorder %s1334_s28, %s1543_s7 }
 0x20e   :  { %p1340_p3 = pnand %p1338_p2, %p1335_p1 }
 0x210   :  { %1343 = shalt.err (!%p1340_p3)
}
 0x211   :  { %914 = dma.vmem_to_hbm [thread:$0]  %s912_s6, 32, %s1543_s7, [#allocation10]   ;;  %1254 = vtanh.f32 %v892_v62 }
 0x212   :  { %s1384_s11 = smov [#allocation11]  }
 0x213   :  { %s921_s2 = sshll.u32 %s1384_s11, 4  ;;  %s922_s2 = int_to_ptr.vmem [resolvable:$true] %s921_s2 }
 0x214   :  { %s1344_s12 = scalar_lea.vmem %s922_s2, 32  ;;  %p1349_p5 = scmp.lt.s32.totalorder %s922_s2, %s922_s2 }
 0x215   :  { %p1345_p4 = scmp.ne.s32.totalorder %s922_s2, %s1344_s12  ;;  %p1350_p6 = scmp.lt.s32.totalorder %s1344_s12, %s1344_s12 }
 0x217   :  { %p1351_p7 = por %p1350_p6, %p1349_p5 }
 0x219   :  { %p1352_p8 = pnand %p1351_p7, %p1345_p4 }
 0x21b   :  { %v1255_v63 = vpop.eup %1254 }
 0x21c   :  { %894 = vst [vmem:[#allocation11] sm:$0x3] %v1255_v63 }
 0x21d   :  { %1355 = shalt.err (!%p1352_p8)
}
 0x21e   :  { %s1356_s15 = scalar_lea.hbm %s1544_s8, 32 }
 0x21f   :  { %p1357_p9 = scmp.ne.s32.totalorder %s1544_s8, %s1356_s15  ;;  %p1360_p10 = scmp.lt.u32.totalorder %s1356_s15, %s1544_s8 }
 0x221   :  { %p1362_p11 = pnand %p1360_p10, %p1357_p9 }
 0x223   :  { %1365 = shalt.err (!%p1362_p11)
}
 0x224   :  { %924 = dma.vmem_to_hbm [thread:$0]  %s922_s2, 32, %s1544_s8, [#allocation10]  }
 0x225   :  { %1370 = dma.done.wait [#allocation5], 256  }
 0x226   :  { %1371 = vsyncadd [#allocation5], 4294967040 }
 0x227   :  { %1372 = dma.done.wait [#allocation10], 64  }
 0x228   :  { %1373 = vsyncadd [#allocation10], 4294967232 }
 0x229   :  { %934 = vsyncpa [#allocation4], 1 }
 0x22a   :  { %935 = vsyncpa [#allocation7], 1 }
 0x22b   :  { %936 = vsyncpa [#allocation5], 1 }
 0x22c   :  { %937 = vsyncpa [#allocation10], 1 }

</bundles_post_ra>
